<compile_context>
chip_gen: v5e
topology: v5e:2x2
jax: 0.10.0
libtpu: 0.0.40
codegen_flags: <defaults>
</compile_context>

<pallas_src>
import numpy as np
import jax
import jax.numpy as jnp
from jax.experimental import pallas as pl
from jax.experimental.pallas import tpu as pltpu


def _cdiv(a, b):
    return -(-a // b)


def _round_up(x, m):
    return ((x + m - 1) // m) * m


def _pow(x, p):
    """Specialize small integer exponents to repeated multiplies (VALU);
    jnp.power (EUP exp/log) only as fallback for non-integer exponents."""
    pf = float(p)
    if pf.is_integer() and 1 <= int(pf) <= 16:
        n = int(pf)
        acc = None
        base = x
        while n:
            if n & 1:
                acc = base if acc is None else acc * base
            n >>= 1
            if n:
                base = base * base
        return acc
    return jnp.power(x, pf)


def _choose_col_tiling(HW, tn_budget):
    """Return (TN, n_jo, n_ji) covering HW columns.

    Guarantees every column block *starts* in-bounds ((n_jo*n_ji-1)*TN < HW),
    TN is a multiple of 128 whenever there is more than one block (otherwise
    TN == HW, exempt from lane alignment), and prefers an even block count so
    the outer axis can be split 2-way for v7x megacore."""
    if HW <= tn_budget and HW < 1024:
        return HW, 1, 1                       # single full-width block
    n0 = max(2, _cdiv(HW, tn_budget))
    fallback = None
    for n_try in (n0, n0 + 1):
        TN = _round_up(_cdiv(HW, n_try), 128)
        n_t = _cdiv(HW, TN)
        if n_t % 2 == 0:
            return TN, 2, n_t // 2
        if fallback is None:
            fallback = (TN, 1, n_t)
    return fallback


def _make_loss_kernel(alpha, gamma, *, R, HW, TM, TN, n_ji,
                      need_row_mask, need_col_mask):
    eps = 1e-12

    def kernel(pred_ref, tgt_ref, cw_ref, hw_ref, out_ref, acc_ref):
        jo = pl.program_id(0)
        i = pl.program_id(1)
        ji = pl.program_id(2)
        nj = pl.num_programs(2)

        @pl.when(ji == 0)
        def _init():
            acc_ref[...] = jnp.zeros_like(acc_ref)

        pred = pred_ref[...].astype(jnp.float32)          # (TM, TN)
        tgt = tgt_ref[...].astype(jnp.float32)            # (TM, TN)

        # Ragged final tiles: the OOB part of the VMEM buffer is undefined, so
        # sanitize it to benign finite values (no NaN/Inf can reach the
        # accumulator); the zero-padded weight side-streams then make its
        # contribution exactly 0.
        if need_row_mask or need_col_mask:
            valid = None
            if need_col_mask:
                col0 = (jo * n_ji + ji) * TN
                col = jax.lax.broadcasted_iota(jnp.int32, (TM, TN), 1) + col0
                valid = col < HW
            if need_row_mask:
                row = jax.lax.broadcasted_iota(jnp.int32, (TM, TN), 0) + i * TM
                rmask = row < R
                valid = rmask if valid is None else (valid & rmask)
            pred = jnp.where(valid, pred, 0.5)
            tgt = jnp.where(valid, tgt, 0.0)

        # Fused focal terms: pos/neg branches are mutually exclusive
        # (neg_w = (1-t)^gamma == 0 exactly where t == 1), so one log and one
        # alpha-pow chain per element suffice (single-slot EUP relief on v7x).
        is_pos = tgt == 1.0                               # torch .eq(1)
        log_arg = jnp.where(is_pos, pred, 1.0 - pred) + eps
        poly_base = jnp.where(is_pos, 1.0 - pred, pred)
        neg_w = jnp.where(is_pos, 1.0, _pow(1.0 - tgt, gamma))
        loss = -jnp.log(log_arg) * _pow(poly_base, alpha) * neg_w

        # class_weight[c] * (gaussian_2d * heatmap_weight + 1.0) reconstructed
        # as an outer-product broadcast (TM,1)*(1,TN); never materialized in HBM.
        w = cw_ref[...] * hw_ref[...]
        acc_ref[...] += loss * w                          # pure VPU per step

        @pl.when(ji == nj - 1)
        def _finalize():
            s = jnp.sum(acc_ref[...])                     # one XLU reduce / slab
            out_ref[...] = jnp.broadcast_to(s, out_ref.shape)

    return kernel


class WeightGaussianFocalLoss:
    """Pallas/JAX port of the PyTorch WeightGaussianFocalLoss forward pass.

    Implements the default path: weight=None, avg_factor=None,
    reduction='mean'.  Targets equal to exactly 1.0 (float equality, matching
    torch .eq(1)) are treated as positives.
    """

    # TODO(synk): `weight`, `avg_factor` and `reduction_override`
    # ('none'/'sum') from the torch forward are not wired through; only the
    # default mean path is kerneled.

    def __init__(self, alpha=2.0, gamma=4.0, reduction='mean', loss_weight=1.0,
                 heatmap_weight=1.0, class_weight=(1.0, 1.0, 1.0)):
        assert reduction == 'mean'
        self.alpha = float(alpha)
        self.gamma = float(gamma)
        self.reduction = reduction
        self.loss_weight = float(loss_weight)
        self.heatmap_weight = float(heatmap_weight)
        self.class_weight = tuple(float(c) for c in class_weight)
        self._cache = {}   # (N,C,H,W,dtype,knobs) -> (jitted fn, cw_col, hw_row)

    def gaussian_2d(self, shape, sigma):
        # NOTE: this is the original maptr formula (an *inverted* gaussian,
        # 1 - exp(...)); kept verbatim from the PyTorch module.
        m, n = [(ss - 1.0) / 2.0 for ss in shape]
        y, x = np.ogrid[-m:m + 1, -n:n + 1]
        h = 1.0 - np.exp(-(x * x + y * y) / (2 * sigma[0] * sigma[1]))
        return h

    # ------------------------------------------------------------------ #
    def _build(self, N, C, H, W, dtype, row_tile, max_block_elems):
        R, HW = N * C, H * W
        max_block_elems = max_block_elems or (1 << 17)    # ~512 KiB f32 / block

        # ---- row tiling ------------------------------------------------
        if row_tile is None:
            if R <= 512:
                TM, n_i = R, 1          # full first dim: exempt from 8-align
            else:
                TM, n_i = 256, _cdiv(R, 256)
        else:
            TM, n_i = int(row_tile), _cdiv(R, int(row_tile))
        need_row_mask = (n_i * TM != R)

        # ---- column tiling (adaptive; >=512 KiB blocks, 2-way outer split)
        tn_budget = max(128, (max_block_elems // TM) // 128 * 128)
        TN, n_jo, n_ji = _choose_col_tiling(HW, tn_budget)
        need_col_mask = (n_jo * n_ji * TN != HW)

        # ---- tiny host-built weight side-streams (cached per shape) -----
        hm = self.gaussian_2d((H, W), sigma=(H / 10.0, W / 10.0))
        hw_row = np.zeros((1, n_jo * n_ji * TN), np.float32)
        hw_row[0, :HW] = (hm * self.heatmap_weight + 1.0).reshape(-1)
        cw_col = np.zeros((n_i * TM, 1), np.float32)
        cw_col[:R, 0] = np.tile(np.asarray(self.class_weight, np.float32), N)
        hw_row = jnp.asarray(hw_row)
        cw_col = jnp.asarray(cw_col)

        kernel = _make_loss_kernel(
            self.alpha, self.gamma, R=R, HW=HW, TM=TM, TN=TN, n_ji=n_ji,
            need_row_mask=need_row_mask, need_col_mask=need_col_mask)

        # VMEM footprint: 2 inputs x 2 pipeline buffers + full-tile f32 acc.
        in_bytes = TM * TN * jnp.dtype(dtype).itemsize
        acc_bytes = TM * TN * 4
        vmem_need = 4 * in_bytes + acc_bytes + (1 << 20)
        vmem_limit = int(min(max(2 * vmem_need, 12 << 20), 24 << 20))

        call = pl.pallas_call(
            kernel,
            out_shape=jax.ShapeDtypeStruct((n_jo, n_i, 8, 128), jnp.float32),
            grid=(n_jo, n_i, n_ji),
            in_specs=[
                pl.BlockSpec((TM, TN), lambda jo, i, ji: (i, jo * n_ji + ji)),
                pl.BlockSpec((TM, TN), lambda jo, i, ji: (i, jo * n_ji + ji)),
                pl.BlockSpec((TM, 1), lambda jo, i, ji: (i, 0)),
                pl.BlockSpec((1, TN), lambda jo, i, ji: (0, jo * n_ji + ji)),
            ],
            out_specs=pl.BlockSpec((1, 1, 8, 128),
                                   lambda jo, i, ji: (jo, i, 0, 0)),
            scratch_shapes=[pltpu.VMEM((TM, TN), jnp.float32)],
            compiler_params=pltpu.CompilerParams(
                dimension_semantics=("parallel", "parallel", "arbitrary"),
                vmem_limit_bytes=vmem_limit),
        )

        scale = self.loss_weight / float(N * C * H * W)

        @jax.jit
        def fn(pred, target, cw, hw):
            # contiguous collapse -> free reshape; NO padding, NO dtype cast
            pred2 = pred.reshape(R, HW)
            tgt2 = target.reshape(R, HW)
            partials = call(pred2, tgt2, cw, hw)
            return partials[:, :, 0, 0].sum() * scale

        return fn, cw_col, hw_row

    # ------------------------------------------------------------------ #
    def __call__(self, pred, target, *, _row_tile=None, _max_block_elems=None):
        N, C, H, W = pred.shape
        assert C == len(self.class_weight)
        key = (N, C, H, W, jnp.dtype(pred.dtype).name, _row_tile, _max_block_elems)
        entry = self._cache.get(key)
        if entry is None:
            entry = self._build(N, C, H, W, pred.dtype, _row_tile, _max_block_elems)
            self._cache[key] = entry
        fn, cw_col, hw_row = entry
        return fn(pred, target, cw_col, hw_row)


# ---------------------------------------------------------------------- #
def _reference_loss(pred, target, hw, class_weight, alpha, gamma, loss_weight):
    """Pure-JAX mirror of the torch math (default path), in f32."""
    eps = 1e-12
    pred = pred.astype(jnp.float32)
    target = target.astype(jnp.float32)
    cw = jnp.asarray(class_weight, jnp.float32).reshape(1, -1, 1, 1)
    gw = jnp.asarray(hw, jnp.float32)[None, None]
    pos_w = (target == 1.0).astype(jnp.float32)
    neg_w = jnp.power(1.0 - target, gamma)
    pos = -jnp.log(pred + eps) * jnp.power(1.0 - pred, alpha) * pos_w * gw * cw
    neg = -jnp.log(1.0 - pred + eps) * jnp.power(pred, alpha) * neg_w * gw * cw
    return loss_weight * jnp.mean(pos + neg)


def _make_inputs(key, shape, dtype=jnp.float32):
    N, C, H, W = shape
    k1, k2 = jax.random.split(key)
    pred = jax.nn.sigmoid(jax.random.normal(k1, shape, dtype=jnp.float32))
    target = jax.random.uniform(k2, shape, dtype=jnp.float32,
                                minval=0.0, maxval=0.95)
    target = target.at[:, :, H // 4, W // 4].set(1.0)
    target = target.at[:, :, (2 * H) // 3, W // 2].set(1.0)
    return pred.astype(dtype), target.astype(dtype)


if __name__ == "__main__":
    loss_mod = WeightGaussianFocalLoss(alpha=2.0, gamma=4.0, reduction='mean',
                                       loss_weight=1.0, heatmap_weight=1.0,
                                       class_weight=[1.0, 1.0, 1.0])

    key = jax.random.PRNGKey(0)
    cases = [
        # (shape, dtype, call kwargs)  -- class_weight has 3 entries -> C=3
        ((2, 3, 16, 16), jnp.float32, {}),                       # single block
        ((2, 3, 25, 45), jnp.float32, {}),                       # 2-way parallel split + ragged col mask
        ((4, 3, 32, 40), jnp.float32, {'_row_tile': 8,           # row mask + multi-step
                                       '_max_block_elems': 2048}),  # ji reduction axis
        ((2, 3, 16, 16), jnp.bfloat16, {}),                      # bf16 inputs accepted as-is
    ]

    for idx, (shape, dtype, kw) in enumerate(cases):
        key, sub = jax.random.split(key)
        pred, target = _make_inputs(sub, shape, dtype)
        loss = loss_mod(pred, target, **kw)
        jax.block_until_ready(loss)

        N, C, H, W = shape
        hm = loss_mod.gaussian_2d((H, W), sigma=(H / 10.0, W / 10.0))
        hw = hm * loss_mod.heatmap_weight + 1.0
        ref = _reference_loss(pred, target, hw, loss_mod.class_weight,
                              loss_mod.alpha, loss_mod.gamma,
                              loss_mod.loss_weight)
        np.testing.assert_allclose(np.asarray(loss, np.float32),
                                   np.asarray(ref, np.float32),
                                   rtol=1e-5, atol=1e-6)

    print("KERNEL_OK")
</pallas_src>

<mosaic_0001>
module attributes {stable_mosaic.version = 11 : i64} {
  func.func @kernel(%arg0: i32, %arg1: i32, %arg2: i32, %arg3: memref<6x256xf32, #tpu.memory_space<vmem>>, %arg4: memref<6x256xf32, #tpu.memory_space<vmem>>, %arg5: memref<6x1xf32, #tpu.memory_space<vmem>>, %arg6: memref<1x256xf32, #tpu.memory_space<vmem>>, %arg7: memref<1x1x8x128xf32, #tpu.memory_space<vmem>>, %arg8: memref<6x256xf32, #tpu.memory_space<vmem>>) attributes {dimension_semantics = [#tpu.dimension_semantics<parallel>, #tpu.dimension_semantics<parallel>, #tpu.dimension_semantics<arbitrary>], iteration_bounds = array<i64: 1, 1, 1>, scalar_prefetch = 0 : i64, scratch_operands = 1 : i64, tpu.core_type = #tpu.core_type<tc>, window_params = [{transform_indices = @transform_0, window_bounds = array<i64: 6, 256>}, {transform_indices = @transform_1, window_bounds = array<i64: 6, 256>}, {transform_indices = @transform_2, window_bounds = array<i64: 6, 1>}, {transform_indices = @transform_3, window_bounds = array<i64: 1, 256>}, {transform_indices = @transform_4, window_bounds = array<i64: 1, 1, 8, 128>}]} {
    %c0_i32 = arith.constant 0 : i32
    %0 = arith.cmpi eq, %arg2, %c0_i32 : i32
    %1 = arith.extui %0 : i1 to i32
    %c0_i32_0 = arith.constant 0 : i32
    %2 = arith.cmpi ne, %1, %c0_i32_0 : i32
    scf.if %2 {
      %cst_20 = arith.constant 0.000000e+00 : f32
      %39 = vector.broadcast %cst_20 : f32 to vector<6x256xf32>
      %c0_21 = arith.constant 0 : index
      %c0_22 = arith.constant 0 : index
      %40 = vector.load %arg8[%c0_21, %c0_22] : memref<6x256xf32, #tpu.memory_space<vmem>>, vector<6x256xf32>
      tpu.vector_store %arg8[%c0_21, %c0_22], %39 {strides = array<i32>} : memref<6x256xf32, #tpu.memory_space<vmem>>, vector<6x256xf32>,
    } else {
    }
    %c0 = arith.constant 0 : index
    %c0_1 = arith.constant 0 : index
    %3 = vector.load %arg3[%c0, %c0_1] : memref<6x256xf32, #tpu.memory_space<vmem>>, vector<6x256xf32>
    %c0_2 = arith.constant 0 : index
    %c0_3 = arith.constant 0 : index
    %4 = vector.load %arg4[%c0_2, %c0_3] : memref<6x256xf32, #tpu.memory_space<vmem>>, vector<6x256xf32>
    %cst = arith.constant 1.000000e+00 : f32
    %5 = vector.broadcast %cst : f32 to vector<6x256xf32>
    %6 = arith.cmpf oeq, %4, %5 : vector<6x256xf32>
    %cst_4 = arith.constant 1.000000e+00 : f32
    %7 = vector.broadcast %cst_4 : f32 to vector<6x256xf32>
    %8 = arith.subf %7, %3 : vector<6x256xf32>
    %9 = arith.select %6, %3, %8 : vector<6x256xi1>, vector<6x256xf32>
    %cst_5 = arith.constant 9.99999996E-13 : f32
    %10 = vector.broadcast %cst_5 : f32 to vector<6x256xf32>
    %11 = arith.addf %9, %10 : vector<6x256xf32>
    %cst_6 = arith.constant 1.000000e+00 : f32
    %12 = vector.broadcast %cst_6 : f32 to vector<6x256xf32>
    %13 = arith.subf %12, %3 : vector<6x256xf32>
    %14 = arith.select %6, %13, %3 : vector<6x256xi1>, vector<6x256xf32>
    %cst_7 = arith.constant 1.000000e+00 : f32
    %15 = vector.broadcast %cst_7 : f32 to vector<6x256xf32>
    %16 = arith.subf %15, %4 : vector<6x256xf32>
    %17 = arith.mulf %16, %16 : vector<6x256xf32>
    %18 = arith.mulf %17, %17 : vector<6x256xf32>
    %cst_8 = arith.constant 1.000000e+00 : f32
    %19 = vector.broadcast %cst_8 : f32 to vector<6x256xf32>
    %20 = arith.select %6, %19, %18 : vector<6x256xi1>, vector<6x256xf32>
    %21 = math.log %11 : vector<6x256xf32>
    %cst_9 = arith.constant 0.000000e+00 : f32
    %22 = vector.broadcast %cst_9 : f32 to vector<6x256xf32>
    %23 = arith.subf %22, %21 : vector<6x256xf32>
    %24 = arith.mulf %14, %14 : vector<6x256xf32>
    %25 = arith.mulf %23, %24 : vector<6x256xf32>
    %26 = arith.mulf %25, %20 : vector<6x256xf32>
    %c0_10 = arith.constant 0 : index
    %c0_11 = arith.constant 0 : index
    %27 = vector.load %arg5[%c0_10, %c0_11] : memref<6x1xf32, #tpu.memory_space<vmem>>, vector<6x1xf32>
    %c0_12 = arith.constant 0 : index
    %c0_13 = arith.constant 0 : index
    %28 = vector.load %arg6[%c0_12, %c0_13] : memref<1x256xf32, #tpu.memory_space<vmem>>, vector<1x256xf32>
    %29 = vector.broadcast %27 : vector<6x1xf32> to vector<6x256xf32>
    %30 = vector.broadcast %28 : vector<1x256xf32> to vector<6x256xf32>
    %31 = arith.mulf %29, %30 : vector<6x256xf32>
    %c0_14 = arith.constant 0 : index
    %c0_15 = arith.constant 0 : index
    %32 = vector.load %arg8[%c0_14, %c0_15] : memref<6x256xf32, #tpu.memory_space<vmem>>, vector<6x256xf32>
    %33 = arith.mulf %26, %31 : vector<6x256xf32>
    %34 = arith.addf %32, %33 : vector<6x256xf32>
    %c0_16 = arith.constant 0 : index
    %c0_17 = arith.constant 0 : index
    %35 = vector.load %arg8[%c0_16, %c0_17] : memref<6x256xf32, #tpu.memory_space<vmem>>, vector<6x256xf32>
    tpu.vector_store %arg8[%c0_16, %c0_17], %34 {strides = array<i32>} : memref<6x256xf32, #tpu.memory_space<vmem>>, vector<6x256xf32>,
    %c0_i32_18 = arith.constant 0 : i32
    %36 = arith.cmpi eq, %arg2, %c0_i32_18 : i32
    %37 = arith.extui %36 : i1 to i32
    %c0_i32_19 = arith.constant 0 : i32
    %38 = arith.cmpi ne, %37, %c0_i32_19 : i32
    scf.if %38 {
      %c0_20 = arith.constant 0 : index
      %c0_21 = arith.constant 0 : index
      %39 = vector.load %arg8[%c0_20, %c0_21] : memref<6x256xf32, #tpu.memory_space<vmem>>, vector<6x256xf32>
      %40 = vector.shape_cast %39 : vector<6x256xf32> to vector<1x6x256xf32>
      %cst_22 = arith.constant dense<0.000000e+00> : vector<1xf32>
      %41 = vector.multi_reduction <add>, %40, %cst_22 [1, 2] : vector<1x6x256xf32> to vector<1xf32>
      %42 = vector.shape_cast %41 : vector<1xf32> to vector<1x1x1xf32>
      %43 = vector.extract %42[0, 0, 0] : f32 from vector<1x1x1xf32>
      %44 = vector.broadcast %43 : f32 to vector<1x1x8x128xf32>
      %c0_23 = arith.constant 0 : index
      %c0_24 = arith.constant 0 : index
      %c0_25 = arith.constant 0 : index
      %c0_26 = arith.constant 0 : index
      %45 = vector.load %arg7[%c0_23, %c0_24, %c0_25, %c0_26] : memref<1x1x8x128xf32, #tpu.memory_space<vmem>>, vector<1x1x8x128xf32>
      tpu.vector_store %arg7[%c0_23, %c0_24, %c0_25, %c0_26], %44 {strides = array<i32>} : memref<1x1x8x128xf32, #tpu.memory_space<vmem>>, vector<1x1x8x128xf32>,
    } else {
    }
    return
  }
  func.func @transform_0(%arg0: i32, %arg1: i32, %arg2: i32) -> (i32, i32) {
    %c1_i32 = arith.constant 1 : i32
    %0 = arith.muli %arg0, %c1_i32 : i32
    %1 = arith.addi %0, %arg2 : i32
    %c0_i32 = arith.constant 0 : i32
    return %arg1, %1 : i32, i32
  }
  func.func @transform_1(%arg0: i32, %arg1: i32, %arg2: i32) -> (i32, i32) {
    %c1_i32 = arith.constant 1 : i32
    %0 = arith.muli %arg0, %c1_i32 : i32
    %1 = arith.addi %0, %arg2 : i32
    %c0_i32 = arith.constant 0 : i32
    return %arg1, %1 : i32, i32
  }
  func.func @transform_2(%arg0: i32, %arg1: i32, %arg2: i32) -> (i32, i32) {
    %c0_i32 = arith.constant 0 : i32
    %c0_i32_0 = arith.constant 0 : i32
    return %arg1, %c0_i32 : i32, i32
  }
  func.func @transform_3(%arg0: i32, %arg1: i32, %arg2: i32) -> (i32, i32) {
    %c1_i32 = arith.constant 1 : i32
    %0 = arith.muli %arg0, %c1_i32 : i32
    %1 = arith.addi %0, %arg2 : i32
    %c0_i32 = arith.constant 0 : i32
    %c0_i32_0 = arith.constant 0 : i32
    return %c0_i32, %1 : i32, i32
  }
  func.func @transform_4(%arg0: i32, %arg1: i32, %arg2: i32) -> (i32, i32, i32, i32) {
    %c0_i32 = arith.constant 0 : i32
    %c0_i32_0 = arith.constant 0 : i32
    %c0_i32_1 = arith.constant 0 : i32
    return %arg0, %arg1, %c0_i32, %c0_i32_0 : i32, i32, i32, i32
  }
}

</mosaic_0001>

<bundles_post_ra>
// kernel: fn.1
= control target key start
LH: loop header
LB: loop body
LE: loop exit
PB: predicated region body
PF: predicated region fallthrough
CT: control target
= control target key end

     0   :  { %v190_v0 = vmov 0   ;;  %v191_v2 = vmov 0.0   ;;  %vm147_vm2 = vcmask 1045504   ;;  %s244_s2 = inlined_call_operand.vmem [shape: f32[6,1], index: 2, kind: input, shape index: {}]   ;;  %s245_s0 = inlined_call_operand.vmem [shape: f32[6,256], index: 0, kind: input, shape index: {}]   ;;  %s246_s1 = inlined_call_operand.vmem [shape: f32[6,256], index: 1, kind: input, shape index: {}]   ;;  %s247_s3 = inlined_call_operand.vmem [shape: f32[1,256], index: 3, kind: input, shape index: {}]   ;;  %s248_s4 = inlined_call_operand.vmem [shape: f32[1,1,8,128], index: 4, kind: output, shape index: {}]  }
   0x1   :  { %185 = vset.pattern.permute.xlu0 %v190_v0  ;;  %v120_v1 = vld [vmem:[%s244_s2] sm:$0x3f]  ;;  %84 = vst [vmem:[#allocation2] sm:$0x3f] %v191_v2  ;;  %v87_v4 = vld [vmem:[%s245_s0 + $0x8] sm:$0x3f] }
   0x2   :  { %124 = vperm.xlu0 %185, %v120_v1   ;;  %85 = vst [vmem:[#allocation2 + $0x8] sm:$0x3f] %v191_v2  ;;  %v86_v3 = vld [vmem:[%s245_s0] sm:$0x3f]  ;;  %v89_v6 = vld [vmem:[%s246_s1 + $0x8] sm:$0x3f] }
   0x3   :  { %v88_v5 = vld [vmem:[%s246_s1] sm:$0x3f]  ;;  %v92_v7 = vsub.f32 1.0, %v86_v3  ;;  %v93_v8 = vsub.f32 1.0, %v87_v4  ;;  %vm91_vm1 = vcmp.eq.f32.partialorder %v89_v6, 1.0  ;;  %v101_v16 = vsub.f32 1.0, %v89_v6 }
   0x4   :  { %vm90_vm0 = vcmp.eq.f32.partialorder %v88_v5, 1.0  ;;  %v100_v15 = vsub.f32 1.0, %v88_v5  ;;  %v121_v29 = vld [vmem:[%s247_s3] sm:$0x3] }
   0x5   :  { %v94_v9 = vsel %vm90_vm0, %v86_v3, %v92_v7  ;;  %v95_v10 = vsel %vm91_vm1, %v87_v4, %v93_v8  ;;  %v98_v19 = vsel %vm90_vm0, %v92_v7, %v86_v3  ;;  %v99_v20 = vsel %vm91_vm1, %v93_v8, %v87_v4 }
   0x6   :  { %v96_v11 = vadd.f32 1e-12, %v94_v9  ;;  %v97_v12 = vadd.f32 1e-12, %v95_v10  ;;  %v102_v21 = vmul.f32 %v100_v15, %v100_v15  ;;  %v103_v22 = vmul.f32 %v101_v16, %v101_v16 }
   0x7   :  { %v114_v25 = vmul.f32 %v98_v19, %v98_v19  ;;  %v115_v26 = vmul.f32 %v99_v20, %v99_v20  ;;  %v128_v34 = vperm.slane %v121_v29, 0  ;;  %v129_v35 = vperm.slane %v121_v29, 1 }
   0x8   :  { %186 = vlog2.f32 %v96_v11  ;;  %v104_v27 = vmul.f32 %v102_v21, %v102_v21  ;;  %v105_v28 = vmul.f32 %v103_v22, %v103_v22  ;;  %v134_v41 = vld [vmem:[#allocation2] sm:$0x3f] }
   0x9   :  { %188 = vlog2.f32 %v97_v12  ;;  %v135_v42 = vld [vmem:[#allocation2 + $0x8] sm:$0x3f] }
   0xa   :  { %v106_v32 = vsel %vm90_vm0, 1.0, %v104_v27  ;;  %v107_v33 = vsel %vm91_vm1, 1.0, %v105_v28 }
   0xe   :  { %v187_v13 = vpop.eup %186 }
   0xf   :  { %v189_v14 = vpop.eup %188  ;;  %v109_v17 = vmul.f32 0.6931472, %v187_v13 }
  0x10   :  { %v111_v18 = vmul.f32 0.6931472, %v189_v14 }
  0x11   :  { %v112_v23 = vsub.f32 0.0, %v109_v17 }
  0x12   :  { %v113_v24 = vsub.f32 0.0, %v111_v18 }
  0x13   :  { %v116_v30 = vmul.f32 %v114_v25, %v112_v23 }
  0x14   :  { %v117_v31 = vmul.f32 %v115_v26, %v113_v24 }
  0x15   :  { %v118_v36 = vmul.f32 %v116_v30, %v106_v32 }
  0x16   :  { %v119_v37 = vmul.f32 %v117_v31, %v107_v33 }
  0x74   :  { %v125_v38 = vpop.permute.xlu0 %124 }
  0x75   :  { %v132_v39 = vmul.f32 %v128_v34, %v125_v38  ;;  %v133_v40 = vmul.f32 %v129_v35, %v125_v38 }
  0x77   :  { %v136_v43 = vmul.f32 %v132_v39, %v118_v36  ;;  %v137_v44 = vmul.f32 %v133_v40, %v119_v37 }
  0x79   :  { %v138_v45 = vadd.f32 %v136_v43, %v134_v41  ;;  %v139_v46 = vadd.f32 %v137_v44, %v135_v42 }
  0x7b   :  { %140 = vst [vmem:[#allocation2] sm:$0x3f] %v138_v45 }
  0x7c   :  { %141 = vst [vmem:[#allocation2 + $0x8] sm:$0x3f] %v139_v46 }
  0x82   :  { %v145_v47 = vld [vmem:[#allocation2] sm:$0x3f] }
  0x83   :  { %v146_v48 = vld [vmem:[#allocation2 + $0x8] sm:$0x3f]  ;;  %v148_v49 = vsel %vm147_vm2, %v145_v47, 0.0 }
  0x84   :  { %v149_v50 = vsel %vm147_vm2, %v146_v48, 0.0 }
  0x85   :  { %v150_v51 = vadd.f32 %v149_v50, %v148_v49 }
  0x87   :  { %151 = vadd.xlane.f32.xlu0 %v150_v51 }
  0xfa   :  { %v152_v52 = vpop.xlane.xlu0 %151 }
  0xfb   :  { %v153_v53 = vrot.slane %v152_v52, 4 }
  0xfd   :  { %v154_v54 = vadd.f32 %v153_v53, %v152_v52 }
  0xff   :  { %v155_v55 = vrot.slane %v154_v54, 2 }
 0x101   :  { %v156_v56 = vadd.f32 %v155_v55, %v154_v54 }
 0x103   :  { %v157_v57 = vrot.slane %v156_v56, 1 }
 0x105   :  { %v158_v58 = vadd.f32 %v157_v57, %v156_v56 }
 0x107   :  { %181 = vpush %v158_v58 }
 0x138   :  { %s182_s2 = spop %181 }
 0x139   :  { %v160_v59 = vstv %s182_s2 }
 0x13a   :  { %161 = vst [vmem:[%s248_s4] sm:$0xff] %v160_v59 }

</bundles_post_ra>
